<compile_context>
chip_gen: v6e
topology: v6e:2x2x1
jax: 0.10.0
libtpu: 0.0.40
codegen_flags: <defaults>
</compile_context>

<pallas_src>
import functools

import jax
import jax.numpy as jnp
from jax.experimental import pallas as pl
from jax.experimental.pallas import tpu as pltpu


# ------------------------------- small helpers -------------------------------
def _round_up(n, m):
    return ((n + m - 1) // m) * m


def _pick_rows_tile(R, D, itemsize, *, max_rows):
    """Largest multiple-of-8 row tile whose x-tile stays within ~4 MiB."""
    budget = 4 * 1024 * 1024
    rows = budget // max(1, D * itemsize)
    rows = max(8, (min(rows, max_rows) // 8) * 8)
    return min(rows, _round_up(R, 8))


def _pick_block_n(d_out, d_in, w_itemsize):
    """Full D_out if the weight is small; otherwise the largest lane-dense
    (multiple-of-128) column block whose weight slab fits an ~8 MiB buffer."""
    if d_out * d_in * w_itemsize <= 8 * 1024 * 1024:
        return d_out
    budget = 8 * 1024 * 1024
    for cand in (2048, 1024, 512, 256, 128):
        if d_out % cand == 0 and d_in * cand * w_itemsize <= budget:
            return cand
    for cand in (128, 256, 512, 1024, 2048):
        if d_out % cand == 0:
            return cand
    return d_out


def _vmem_limit_bytes(est_bytes):
    # Raise the scoped-VMEM limit above the 16/32 MiB defaults so large tiles
    # compile, but stay comfortably under v7x's 64 MiB physical VMEM.
    return int(min(max(2 * est_bytes, 32 * 1024 * 1024), 48 * 1024 * 1024))


# --------------------- fused LayerNorm + Linear (fast path) -------------------
def _prenorm_linear_kernel(x_ref, w_ref, b_ref, o_ref, y_ref, *, eps, mxu_dtype):
    # Normalize the row tile once per row block (j == 0) into VMEM scratch and
    # reuse it across all D_out column blocks.
    @pl.when(pl.program_id(1) == 0)
    def _():
        x = x_ref[...].astype(jnp.float32)                    # (tm, D)
        mean = jnp.mean(x, axis=-1, keepdims=True)
        xc = x - mean
        var = jnp.mean(xc * xc, axis=-1, keepdims=True)
        # gamma/beta are folded into w_eff/b_eff by the wrapper.
        y_ref[...] = (xc * jax.lax.rsqrt(var + eps)).astype(mxu_dtype)

    acc = jnp.dot(y_ref[...], w_ref[...],
                  preferred_element_type=jnp.float32)          # (tm, bn) on MXU
    o_ref[...] = (acc + b_ref[...].astype(jnp.float32)).astype(o_ref.dtype)


def prenorm_linear_pallas(x2d, gamma, beta, w, b, *, eps=1e-5, rows_tile=None,
                          block_n=None, mxu_dtype=None):
    """Fused LayerNorm(D) + Linear(D, D_out). x2d: (R, D); w: (D, D_out); b: (D_out,)."""
    R, D = x2d.shape
    D_out = w.shape[1]
    if mxu_dtype is None:
        mxu_dtype = x2d.dtype      # pass jnp.bfloat16 on v6e/v7x for large model dims

    # Fold gamma/beta into the linear (exact algebra):
    #   (y*gamma + beta) @ W + b == y @ (gamma[:, None] * W) + (beta @ W + b)
    w32 = w.astype(jnp.float32)
    w_eff = (gamma.astype(jnp.float32)[:, None] * w32).astype(mxu_dtype)
    b_eff = (b.astype(jnp.float32) + beta.astype(jnp.float32) @ w32).reshape(1, D_out)

    x_item = jnp.dtype(x2d.dtype).itemsize
    w_item = jnp.dtype(mxu_dtype).itemsize

    bn = _pick_block_n(D_out, D, w_item) if block_n is None else block_n
    assert D_out % bn == 0 and (bn == D_out or bn % 128 == 0)

    if rows_tile is None:
        tm = _pick_rows_tile(R, D, x_item, max_rows=256)
    else:
        tm = min(rows_tile, _round_up(R, 8))
    assert tm % 8 == 0
    R_pad = _round_up(R, tm)
    if R_pad != R:
        x2d = jnp.pad(x2d, ((0, R_pad - R), (0, 0)))          # padded rows sliced off

    est = (2 * tm * D * x_item          # x tile, double-buffered
           + tm * D * w_item            # normalized-x scratch
           + 2 * D * bn * w_item        # weight column block, double-buffered
           + 2 * bn * 4                 # bias block
           + 2 * tm * bn * x_item       # output tile, double-buffered
           + tm * max(D, bn) * 4)       # in-kernel f32 temporaries

    out = pl.pallas_call(
        functools.partial(_prenorm_linear_kernel, eps=eps, mxu_dtype=mxu_dtype),
        out_shape=jax.ShapeDtypeStruct((R_pad, D_out), x2d.dtype),
        grid_spec=pltpu.PrefetchScalarGridSpec(
            num_scalar_prefetch=0,
            grid=(R_pad // tm, D_out // bn),
            in_specs=[
                pl.BlockSpec((tm, D), lambda i, j: (i, 0)),   # x tile (held across j)
                pl.BlockSpec((D, bn), lambda i, j: (0, j)),   # weight column block
                pl.BlockSpec((1, bn), lambda i, j: (0, j)),   # bias block
            ],
            out_specs=pl.BlockSpec((tm, bn), lambda i, j: (i, j)),
            scratch_shapes=[pltpu.VMEM((tm, D), mxu_dtype)],  # normalized row tile
        ),
        compiler_params=pltpu.CompilerParams(
            dimension_semantics=("parallel", "arbitrary"),
            vmem_limit_bytes=_vmem_limit_bytes(est)),
    )(x2d, w_eff, b_eff)
    return out[:R] if R_pad != R else out


# ----------------------- standalone LayerNorm (generic fn) --------------------
def _layernorm_kernel(x_ref, gamma_ref, beta_ref, o_ref, *, eps):
    x = x_ref[...].astype(jnp.float32)                        # (tm, D)
    mean = jnp.mean(x, axis=-1, keepdims=True)
    xc = x - mean
    var = jnp.mean(xc * xc, axis=-1, keepdims=True)
    y = xc * jax.lax.rsqrt(var + eps)
    y = y * gamma_ref[...].astype(jnp.float32) + beta_ref[...].astype(jnp.float32)
    o_ref[...] = y.astype(o_ref.dtype)


def layernorm_pallas(x2d, gamma, beta, *, eps=1e-5, rows_tile=None):
    """x2d: (R, D); gamma/beta: (D,). LayerNorm over the last dim."""
    R, D = x2d.shape
    itm = jnp.dtype(x2d.dtype).itemsize
    if rows_tile is None:
        tm = _pick_rows_tile(R, D, itm, max_rows=512)          # mem-bound: go bigger
    else:
        tm = min(rows_tile, _round_up(R, 8))
    assert tm % 8 == 0
    R_pad = _round_up(R, tm)
    if R_pad != R:
        x2d = jnp.pad(x2d, ((0, R_pad - R), (0, 0)))

    est = 4 * tm * D * itm + tm * D * 4 + 2 * D * 8

    out = pl.pallas_call(
        functools.partial(_layernorm_kernel, eps=eps),
        out_shape=jax.ShapeDtypeStruct((R_pad, D), x2d.dtype),
        grid_spec=pltpu.PrefetchScalarGridSpec(
            num_scalar_prefetch=0,
            grid=(R_pad // tm,),
            in_specs=[
                pl.BlockSpec((tm, D), lambda i: (i, 0)),
                pl.BlockSpec((1, D), lambda i: (0, 0)),
                pl.BlockSpec((1, D), lambda i: (0, 0)),
            ],
            out_specs=pl.BlockSpec((tm, D), lambda i: (i, 0)),
        ),
        compiler_params=pltpu.CompilerParams(
            dimension_semantics=("parallel",),
            vmem_limit_bytes=_vmem_limit_bytes(est)),
    )(x2d, gamma.reshape(1, D), beta.reshape(1, D))
    return out[:R] if R_pad != R else out


# ------------------------- standalone Linear (example fn) ---------------------
def _linear_kernel(x_ref, w_ref, b_ref, o_ref, *, mxu_dtype):
    acc = jnp.dot(x_ref[...].astype(mxu_dtype), w_ref[...],
                  preferred_element_type=jnp.float32)
    o_ref[...] = (acc + b_ref[...].astype(jnp.float32)).astype(o_ref.dtype)


def linear_pallas(x2d, w, b, *, rows_tile=None, block_n=None, mxu_dtype=None):
    """x2d: (R, D); w: (D, D_out); b: (D_out,)."""
    R, D = x2d.shape
    D_out = w.shape[1]
    if mxu_dtype is None:
        mxu_dtype = x2d.dtype
    x_item = jnp.dtype(x2d.dtype).itemsize
    w_item = jnp.dtype(mxu_dtype).itemsize

    bn = _pick_block_n(D_out, D, w_item) if block_n is None else block_n
    assert D_out % bn == 0 and (bn == D_out or bn % 128 == 0)

    if rows_tile is None:
        tm = _pick_rows_tile(R, D, x_item, max_rows=256)
    else:
        tm = min(rows_tile, _round_up(R, 8))
    assert tm % 8 == 0
    R_pad = _round_up(R, tm)
    if R_pad != R:
        x2d = jnp.pad(x2d, ((0, R_pad - R), (0, 0)))

    est = (2 * tm * D * x_item + 2 * D * bn * w_item + 2 * bn * 4
           + 2 * tm * bn * x_item + tm * bn * 4)

    out = pl.pallas_call(
        functools.partial(_linear_kernel, mxu_dtype=mxu_dtype),
        out_shape=jax.ShapeDtypeStruct((R_pad, D_out), x2d.dtype),
        grid_spec=pltpu.PrefetchScalarGridSpec(
            num_scalar_prefetch=0,
            grid=(R_pad // tm, D_out // bn),
            in_specs=[
                pl.BlockSpec((tm, D), lambda i, j: (i, 0)),
                pl.BlockSpec((D, bn), lambda i, j: (0, j)),
                pl.BlockSpec((1, bn), lambda i, j: (0, j)),
            ],
            out_specs=pl.BlockSpec((tm, bn), lambda i, j: (i, j)),
        ),
        compiler_params=pltpu.CompilerParams(
            dimension_semantics=("parallel", "arbitrary"),
            vmem_limit_bytes=_vmem_limit_bytes(est)),
    )(x2d, w.astype(mxu_dtype), b.astype(jnp.float32).reshape(1, D_out))
    return out[:R] if R_pad != R else out


# ----------------------------------- PreNorm ----------------------------------
class PallasLinear:
    """Example `fn`: y = x @ w + b, run as a Pallas kernel."""

    def __init__(self, w, b, *, mxu_dtype=None):
        self.w, self.b, self.mxu_dtype = w, b, mxu_dtype

    def __call__(self, x):
        B, S, D = x.shape
        out = linear_pallas(x.reshape(B * S, D), self.w, self.b,
                            mxu_dtype=self.mxu_dtype)
        return out.reshape(B, S, -1)


class PreNormPallas:
    """Equivalent of PyTorch PreNorm: fn(LayerNorm(dim)(x), **kwargs)."""

    def __init__(self, dim, fn, *, eps=1e-5):
        self.dim, self.fn, self.eps = dim, fn, eps
        # nn.LayerNorm default init: weight = ones, bias = zeros
        self.gamma = jnp.ones((dim,), jnp.float32)
        self.beta = jnp.zeros((dim,), jnp.float32)

    def __call__(self, x, **kwargs):
        B, S, D = x.shape
        assert D == self.dim
        x2d = x.reshape(B * S, D)
        if isinstance(self.fn, PallasLinear) and not kwargs:
            # Fast path: LayerNorm + Linear fused into one kernel — the
            # normalized activations never hit HBM.
            out = prenorm_linear_pallas(x2d, self.gamma, self.beta,
                                        self.fn.w, self.fn.b, eps=self.eps,
                                        mxu_dtype=self.fn.mxu_dtype)
            return out.reshape(B, S, -1)
        # Generic path: standalone LayerNorm kernel, then arbitrary fn.
        normed = layernorm_pallas(x2d, self.gamma, self.beta, eps=self.eps)
        return self.fn(normed.reshape(B, S, D), **kwargs)


if __name__ == "__main__":
    B, S, D = 2, 8, 32
    key = jax.random.PRNGKey(0)
    kx, kw, kb = jax.random.split(key, 3)

    x = jax.random.normal(kx, (B, S, D), dtype=jnp.float32)
    w = jax.random.normal(kw, (D, D), dtype=jnp.float32) * 0.02
    b = jax.random.normal(kb, (D,), dtype=jnp.float32) * 0.02

    # Plain-JAX reference.
    mean = jnp.mean(x, axis=-1, keepdims=True)
    var = jnp.mean((x - mean) ** 2, axis=-1, keepdims=True)
    ref_norm = (x - mean) / jnp.sqrt(var + 1e-5)
    ref = jnp.einsum("bsd,de->bse", ref_norm, w) + b

    # 1) Fused PreNorm + Linear path.
    prenorm = PreNormPallas(D, PallasLinear(w, b))
    out = jax.block_until_ready(prenorm(x))
    assert out.shape == (B, S, D)
    assert jnp.allclose(out, ref, atol=1e-4, rtol=1e-4)

    # 2) Generic path: standalone LayerNorm kernel + arbitrary fn.
    prenorm_gen = PreNormPallas(D, lambda z: z * 2.0)
    out_gen = jax.block_until_ready(prenorm_gen(x))
    assert jnp.allclose(out_gen, ref_norm * 2.0, atol=1e-4, rtol=1e-4)

    # 3) Standalone Pallas Linear (the example fn on its own).
    out_lin = jax.block_until_ready(PallasLinear(w, b)(x))
    ref_lin = jnp.einsum("bsd,de->bse", x, w) + b
    assert jnp.allclose(out_lin, ref_lin, atol=1e-4, rtol=1e-4)

    # 4) Row count not a multiple of 8 — exercises the padding path.
    x_odd = jax.random.normal(kx, (2, 7, D), dtype=jnp.float32)
    out_odd = jax.block_until_ready(PreNormPallas(D, PallasLinear(w, b))(x_odd))
    m_o = jnp.mean(x_odd, axis=-1, keepdims=True)
    v_o = jnp.mean((x_odd - m_o) ** 2, axis=-1, keepdims=True)
    ref_odd = jnp.einsum("bsd,de->bse", (x_odd - m_o) / jnp.sqrt(v_o + 1e-5), w) + b
    assert jnp.allclose(out_odd, ref_odd, atol=1e-4, rtol=1e-4)

    print("KERNEL_OK")
</pallas_src>

<mosaic_0001>
module attributes {stable_mosaic.version = 11 : i64} {
  func.func @_prenorm_linear_kernel(%arg0: i32, %arg1: i32, %arg2: memref<16x32xf32, #tpu.memory_space<vmem>>, %arg3: memref<32x32xf32, #tpu.memory_space<vmem>>, %arg4: memref<1x32xf32, #tpu.memory_space<vmem>>, %arg5: memref<16x32xf32, #tpu.memory_space<vmem>>, %arg6: memref<16x32xf32, #tpu.memory_space<vmem>>) attributes {dimension_semantics = [#tpu.dimension_semantics<parallel>, #tpu.dimension_semantics<arbitrary>], iteration_bounds = array<i64: 1, 1>, scalar_prefetch = 0 : i64, scratch_operands = 1 : i64, tpu.core_type = #tpu.core_type<tc>, window_params = [{transform_indices = @transform_0, window_bounds = array<i64: 16, 32>}, {transform_indices = @transform_1, window_bounds = array<i64: 32, 32>}, {transform_indices = @transform_2, window_bounds = array<i64: 1, 32>}, {transform_indices = @transform_3, window_bounds = array<i64: 16, 32>}]} {
    %c0_i32 = arith.constant 0 : i32
    %0 = arith.cmpi eq, %arg1, %c0_i32 : i32
    %1 = arith.extui %0 : i1 to i32
    %c0_i32_0 = arith.constant 0 : i32
    %2 = arith.cmpi ne, %1, %c0_i32_0 : i32
    scf.if %2 {
      %c0_8 = arith.constant 0 : index
      %c0_9 = arith.constant 0 : index
      %10 = vector.load %arg2[%c0_8, %c0_9] : memref<16x32xf32, #tpu.memory_space<vmem>>, vector<16x32xf32>
      %cst_10 = arith.constant dense<0.000000e+00> : vector<16xf32>
      %11 = vector.multi_reduction <add>, %10, %cst_10 [1] : vector<16x32xf32> to vector<16xf32>
      %12 = vector.shape_cast %11 : vector<16xf32> to vector<16x1xf32>
      %cst_11 = arith.constant 3.200000e+01 : f32
      %13 = vector.broadcast %cst_11 : f32 to vector<16x1xf32>
      %14 = arith.divf %12, %13 : vector<16x1xf32>
      %15 = vector.broadcast %14 : vector<16x1xf32> to vector<16x32xf32>
      %16 = arith.subf %10, %15 : vector<16x32xf32>
      %17 = arith.mulf %16, %16 : vector<16x32xf32>
      %cst_12 = arith.constant dense<0.000000e+00> : vector<16xf32>
      %18 = vector.multi_reduction <add>, %17, %cst_12 [1] : vector<16x32xf32> to vector<16xf32>
      %19 = vector.shape_cast %18 : vector<16xf32> to vector<16x1xf32>
      %cst_13 = arith.constant 3.200000e+01 : f32
      %20 = vector.broadcast %cst_13 : f32 to vector<16x1xf32>
      %21 = arith.divf %19, %20 : vector<16x1xf32>
      %cst_14 = arith.constant 9.99999974E-6 : f32
      %22 = vector.broadcast %cst_14 : f32 to vector<16x1xf32>
      %23 = arith.addf %21, %22 : vector<16x1xf32>
      %24 = math.rsqrt %23 : vector<16x1xf32>
      %25 = vector.broadcast %24 : vector<16x1xf32> to vector<16x32xf32>
      %26 = arith.mulf %16, %25 : vector<16x32xf32>
      %c0_15 = arith.constant 0 : index
      %c0_16 = arith.constant 0 : index
      %27 = vector.load %arg6[%c0_15, %c0_16] : memref<16x32xf32, #tpu.memory_space<vmem>>, vector<16x32xf32>
      tpu.vector_store %arg6[%c0_15, %c0_16], %26 {strides = array<i32>} : memref<16x32xf32, #tpu.memory_space<vmem>>, vector<16x32xf32>,
    } else {
    }
    %c0 = arith.constant 0 : index
    %c0_1 = arith.constant 0 : index
    %3 = vector.load %arg6[%c0, %c0_1] : memref<16x32xf32, #tpu.memory_space<vmem>>, vector<16x32xf32>
    %c0_2 = arith.constant 0 : index
    %c0_3 = arith.constant 0 : index
    %4 = vector.load %arg3[%c0_2, %c0_3] : memref<32x32xf32, #tpu.memory_space<vmem>>, vector<32x32xf32>
    %cst = arith.constant dense<0.000000e+00> : vector<16x32xf32>
    %5 = tpu.matmul %3, %4, %cst {dimension_numbers = #tpu.dot_dimension_numbers<[1], [0], [0], [1], [0, 0, 1, 1], [], []>} : vector<16x32xf32>, vector<32x32xf32>, vector<16x32xf32> -> vector<16x32xf32>
    %c0_4 = arith.constant 0 : index
    %c0_5 = arith.constant 0 : index
    %6 = vector.load %arg4[%c0_4, %c0_5] : memref<1x32xf32, #tpu.memory_space<vmem>>, vector<1x32xf32>
    %7 = vector.broadcast %6 : vector<1x32xf32> to vector<16x32xf32>
    %8 = arith.addf %5, %7 : vector<16x32xf32>
    %c0_6 = arith.constant 0 : index
    %c0_7 = arith.constant 0 : index
    %9 = vector.load %arg5[%c0_6, %c0_7] : memref<16x32xf32, #tpu.memory_space<vmem>>, vector<16x32xf32>
    tpu.vector_store %arg5[%c0_6, %c0_7], %8 {strides = array<i32>} : memref<16x32xf32, #tpu.memory_space<vmem>>, vector<16x32xf32>,
    return
  }
  func.func @transform_0(%arg0: i32, %arg1: i32) -> (i32, i32) {
    %c0_i32 = arith.constant 0 : i32
    %c0_i32_0 = arith.constant 0 : i32
    return %arg0, %c0_i32 : i32, i32
  }
  func.func @transform_1(%arg0: i32, %arg1: i32) -> (i32, i32) {
    %c0_i32 = arith.constant 0 : i32
    %c0_i32_0 = arith.constant 0 : i32
    return %c0_i32, %arg1 : i32, i32
  }
  func.func @transform_2(%arg0: i32, %arg1: i32) -> (i32, i32) {
    %c0_i32 = arith.constant 0 : i32
    %c0_i32_0 = arith.constant 0 : i32
    return %c0_i32, %arg1 : i32, i32
  }
  func.func @transform_3(%arg0: i32, %arg1: i32) -> (i32, i32) {
    %c0_i32 = arith.constant 0 : i32
    return %arg0, %arg1 : i32, i32
  }
}

</mosaic_0001>

<bundles_post_ra>
// kernel: tpu_custom_call.1
= control target key start
LH: loop header
LB: loop body
LE: loop exit
PB: predicated region body
PF: predicated region fallthrough
CT: control target
= control target key end

     0   :  { %8 = vsyncpa [#allocation4], 0  ;;  %s345_s0 = inlined_call_operand.hbm [shape: f32[16,32], index: 0, kind: input, shape index: {}]   ;;  %s346_s1 = inlined_call_operand.hbm [shape: f32[32,32], index: 1, kind: input, shape index: {}]   ;;  %s347_s2 = inlined_call_operand.vmem [shape: f32[1,32], index: 2, kind: input, shape index: {}]   ;;  %s348_s3 = inlined_call_operand.hbm [shape: f32[16,32], index: 3, kind: output, shape index: {}]  }
   0x1   :  { %9 = vsyncpa [#allocation7], 0 }
   0x2   :  { %10 = vsyncpa [#allocation5], 0  ;;  %s289_s12 = smov [#allocation3]  }
   0x3   :  { %s16_s13 = sshll.u32 %s289_s12, 4  ;;  %s17_s13 = int_to_ptr.vmem [resolvable:$true] %s16_s13 }
   0x4   :  { %s231_s14 = scalar_lea.vmem %s17_s13, 256  ;;  %p236_p1 = scmp.lt.s32.totalorder %s17_s13, %s17_s13 }
   0x5   :  { %p232_p0 = scmp.ne.s32.totalorder %s17_s13, %s231_s14  ;;  %p237_p2 = scmp.lt.s32.totalorder %s231_s14, %s231_s14 }
   0x7   :  { %p238_p3 = por %p237_p2, %p236_p1 }
   0x9   :  { %p239_p4 = pnand %p238_p3, %p232_p0 }
   0xb   :  { %242 = shalt.err (!%p239_p4)
}
   0xc   :  { %s290_s15 = smov 128   ;;  %s291_s16 = smov 8  }
   0xd   :  { %22 = dma.hbm_to_vmem [thread:$0]  %s345_s0, 256, %s17_s13, [#allocation4], %s290_s15, %s290_s15, %s291_s16  }
   0xe   :  { %s292_s19 = smov [#allocation6]  }
   0xf   :  { %s28_s20 = sshll.u32 %s292_s19, 4  ;;  %s29_s20 = int_to_ptr.vmem [resolvable:$true] %s28_s20 }
  0x10   :  { %s251_s21 = scalar_lea.vmem %s29_s20, 512  ;;  %p256_p6 = scmp.lt.s32.totalorder %s29_s20, %s29_s20 }
  0x11   :  { %p252_p5 = scmp.ne.s32.totalorder %s29_s20, %s251_s21  ;;  %p257_p7 = scmp.lt.s32.totalorder %s251_s21, %s251_s21 }
  0x13   :  { %p258_p8 = por %p257_p7, %p256_p6 }
  0x15   :  { %p259_p9 = pnand %p258_p8, %p252_p5 }
  0x17   :  { %262 = shalt.err (!%p259_p9)
}
  0x18   :  { %34 = dma.hbm_to_vmem [thread:$0]  %s346_s1, 512, %s29_s20, [#allocation7], %s290_s15, %s290_s15, %s291_s16  }
  0x19   :  { %283 = dma.done.wait [#allocation4], 256  }
  0x1a   :  { %284 = vsyncadd [#allocation4], 4294967040 }
  0x1b   :  { %285 = dma.done.wait [#allocation7], 512  }
  0x1c   :  { %286 = vsyncadd [#allocation7], 4294966784  ;;  %vm49_vm0 = vcmask 261120   ;;  %v47_v0 = vld [vmem:[#allocation3] sm:$0xff]  ;;  %v48_v1 = vld [vmem:[#allocation3 + $0x8] sm:$0xff]  ;;  %s293_s24 = smov [#allocation8]  }
  0x1d   :  { %v50_v2 = vsel %vm49_vm0, %v47_v0, 0.0  ;;  %v53_v3 = vsel %vm49_vm0, %v48_v1, 0.0  ;;  %v84_v14 = vld [vmem:[#allocation6 + $0x18] sm:$0xff]  ;;  %v83_v15 = vld [vmem:[#allocation6 + $0x10] sm:$0xff]  ;;  %v82_v16 = vld [vmem:[#allocation6 + $0x8] sm:$0xff]  ;;  %s181_s25 = sshll.u32 %s293_s24, 4  ;;  %s182_s25 = int_to_ptr.vmem [resolvable:$true] %s181_s25 }
  0x1e   :  { %51 = vadd.xlane.f32.xlu0 %v50_v2  ;;  %203 = vmatprep.subr.mxu0 %v84_v14  ;;  %v81_v17 = vld [vmem:[#allocation6] sm:$0xff]  ;;  %s263_s26 = scalar_lea.vmem %s182_s25, 256  ;;  %p268_p11 = scmp.lt.s32.totalorder %s182_s25, %s182_s25 }
  0x1f   :  { %204 = vmatpush3.msra.mxu0 %v84_v14  ;;  %v194_v30 = vld [vmem:[%s347_s2] ss:$0 sm:$0xff]  ;;  %p264_p10 = scmp.ne.s32.totalorder %s182_s25, %s263_s26  ;;  %p269_p12 = scmp.lt.s32.totalorder %s263_s26, %s263_s26 }
  0x20   :  { %205 = vmatprep.subr.mxu0 %v83_v15 }
  0x21   :  { %206 = vmatpush3.msra.mxu0 %v83_v15  ;;  %p270_p13 = por %p269_p12, %p268_p11 }
  0x22   :  { %54 = vadd.xlane.f32.xlu0 %v53_v3  ;;  %207 = vmatprep.subr.mxu0 %v82_v16 }
  0x23   :  { %208 = vmatpush3.msra.mxu0 %v82_v16  ;;  %p271_p0 = pnand %p270_p13, %p264_p10 }
  0x24   :  { %209 = vmatprep.subr.mxu0 %v81_v17 }
  0x25   :  { %210 = vmatpush3.msra.mxu0 %v81_v17 }
  0xa7   :  { %v52_v4 = vpop.xlane.xlu0 %51 }
  0xa8   :  { %v57_v5 = vmul.f32 0.03125, %v52_v4 }
  0xaa   :  { %v59_v6 = vsub.f32 %v47_v0, %v57_v5 }
  0xab   :  { %v55_v7 = vpop.xlane.xlu0 %54 }
  0xac   :  { %v58_v8 = vmul.f32 0.03125, %v55_v7  ;;  %v61_v9 = vmul.f32 %v59_v6, %v59_v6 }
  0xae   :  { %v60_v10 = vsub.f32 %v48_v1, %v58_v8  ;;  %v63_v11 = vsel %vm49_vm0, %v61_v9, 0.0 }
  0xaf   :  { %64 = vadd.xlane.f32.xlu1 %v63_v11 }
  0xb0   :  { %v62_v12 = vmul.f32 %v60_v10, %v60_v10 }
  0xb2   :  { %v66_v13 = vsel %vm49_vm0, %v62_v12, 0.0 }
  0xb3   :  { %67 = vadd.xlane.f32.xlu1 %v66_v13 }
 0x138   :  { %v65_v18 = vpop.xlane.xlu1 %64 }
 0x139   :  { %v69_v19 = vmul.f32 0.03125, %v65_v18 }
 0x13b   :  { %v71_v20 = vadd.f32 1e-05, %v69_v19 }
 0x13c   :  { %v68_v21 = vpop.xlane.xlu1 %67 }
 0x13d   :  { %219 = vrsqrt.f32 %v71_v20  ;;  %v70_v22 = vmul.f32 0.03125, %v68_v21 }
 0x13f   :  { %v72_v23 = vadd.f32 1e-05, %v70_v22 }
 0x141   :  { %221 = vrsqrt.f32 %v72_v23 }
 0x14a   :  { %v220_v24 = vpop.eup %219 }
 0x14b   :  { %v75_v25 = vmul.f32 %v220_v24, %v59_v6 }
 0x14d   :  { %77 = vst.msk [vmem:[#allocation2] sm:$0xff] %vm49_vm0, %v75_v25 }
 0x14e   :  { %v222_v26 = vpop.eup %221 }
 0x14f   :  { %v76_v27 = vmul.f32 %v222_v26, %v60_v10 }
 0x151   :  { %78 = vst.msk [vmem:[#allocation2 + $0x8] sm:$0xff] %vm49_vm0, %v76_v27 }
 0x154   :  { %v79_v28 = vld [vmem:[#allocation2] sm:$0xff] }
 0x155   :  { %211 = vmatprep.mubr.msk.f32.mxu0 %vm49_vm0, %v79_v28 }
 0x158   :  { %v80_v29 = vld [vmem:[#allocation2 + $0x8] sm:$0xff] }
 0x159   :  { %212 = vmatmul.mubr.msk.f32.vlgmr.msra.gmra.mxu0 %vm49_vm0, %v80_v29 }
 0x219   :  { %v213_v31 = vpop.f32.mrf.mxu0 }
 0x21a   :  { %v171_v32 = vadd.f32 %v213_v31, %v194_v30 }
 0x21b   :  { %v165_v33 = vpop.f32.mrf.mxu0 }
 0x21c   :  { %175 = vst.msk [vmem:[#allocation8 + $0x8] sm:$0xff] %vm49_vm0, %v171_v32  ;;  %v166_v34 = vadd.f32 %v194_v30, %v165_v33 }
 0x21e   :  { %174 = vst.msk [vmem:[#allocation8] sm:$0xff] %vm49_vm0, %v166_v34 }
 0x21f   :  { %274 = shalt.err (!%p271_p0)
}
 0x220   :  { %187 = dma.vmem_to_hbm [thread:$0]  %s182_s25, 256, %s348_s3, [#allocation5], %s290_s15, %s290_s15, %s291_s16  }
 0x221   :  { %287 = dma.done.wait [#allocation5], 256  }
 0x222   :  { %288 = vsyncadd [#allocation5], 4294967040 }
 0x223   :  { %191 = vsyncpa [#allocation4], 1 }
 0x224   :  { %192 = vsyncpa [#allocation7], 1 }
 0x225   :  { %193 = vsyncpa [#allocation5], 1 }

</bundles_post_ra>
